<compile_context>
chip_gen: v5e
topology: v5e:2x2
jax: 0.10.0
libtpu: 0.0.40
codegen_flags: <defaults>
</compile_context>

<pallas_src>
import functools
import math

import jax
import jax.numpy as jnp
from jax import lax
from jax.experimental import pallas as pl
from jax.experimental.pallas import tpu as pltpu

NEG_INF = -1e30
LN_EPS = 1e-5


# ----------------------------- tiled linear -----------------------------

def _linear_kernel(x_ref, w_ref, b_ref, o_ref, acc_ref, *, activation):
    @pl.when(pl.program_id(2) == 0)
    def _():
        acc_ref[...] = jnp.zeros_like(acc_ref)

    acc_ref[...] += jnp.dot(x_ref[...].astype(w_ref.dtype), w_ref[...],
                            preferred_element_type=jnp.float32)

    @pl.when(pl.program_id(2) == pl.num_programs(2) - 1)
    def _():
        y = acc_ref[...] + b_ref[...]
        if activation == "relu":
            y = jnp.maximum(y, 0.0)
        elif activation == "tanh":
            y = jnp.tanh(y)
        o_ref[...] = y


def linear(x, p, activation=None):
    """y = act(x @ w + b). Tiled matmul with f32 VMEM accumulator."""
    w, b = p["w"], p["b"]
    lead = x.shape[:-1]
    K = x.shape[-1]
    N = w.shape[1]
    M = math.prod(lead) if lead else 1
    x2 = x.reshape(M, K).astype(jnp.float32)

    # Tile sizes: full dim when small (satisfies (8,128) via full-dim blocks),
    # otherwise 128/256-aligned tiles.  K tiles must divide K exactly
    # (reduction axis must never read OOB garbage).
    tm = M if M <= 256 else 256
    tn = N if (N <= 256 or N % 256 != 0) else 256
    tk = K if (K <= 512 or K % 512 != 0) else 512
    grid = (pl.cdiv(M, tm), pl.cdiv(N, tn), K // tk)

    cost = pl.CostEstimate(flops=2 * M * N * K, transcendentals=0,
                           bytes_accessed=4 * M * K + 2 * K * N + 4 * M * N)

    out = pl.pallas_call(
        functools.partial(_linear_kernel, activation=activation),
        out_shape=jax.ShapeDtypeStruct((M, N), jnp.float32),
        grid=grid,
        in_specs=[
            pl.BlockSpec((tm, tk), lambda i, j, k: (i, k)),
            pl.BlockSpec((tk, tn), lambda i, j, k: (k, j)),
            pl.BlockSpec((1, tn), lambda i, j, k: (0, j)),
        ],
        out_specs=pl.BlockSpec((tm, tn), lambda i, j, k: (i, j)),
        scratch_shapes=[pltpu.VMEM((tm, tn), jnp.float32)],
        compiler_params=pltpu.CompilerParams(
            dimension_semantics=("parallel", "parallel", "arbitrary")),
        cost_estimate=cost,
    )(x2, w, b.reshape(1, N))
    return out.reshape(lead + (N,))


# ------------------- fused MHA (+ residual [+ LayerNorm]) -------------------

def _mha_kernel(xq_ref, xkv_ref, mask_ref, wq_ref, bq_ref, wkv_ref, bkv_ref,
                wo_ref, bo_ref, *rest, num_heads, scale, has_ln, eps):
    if has_ln:
        g_ref, beta_ref, o_ref = rest
    else:
        (o_ref,) = rest

    xq = xq_ref[0]                                  # (Sq, E) f32
    xkv = xkv_ref[0]                                # (Sk, E) f32
    E = xq.shape[-1]
    dh = E // num_heads
    cdt = wq_ref.dtype                              # bf16 compute dtype

    # fused projections (MXU, f32 accumulation)
    q = jnp.dot(xq.astype(cdt), wq_ref[...],
                preferred_element_type=jnp.float32) + bq_ref[...]
    kv = jnp.dot(xkv.astype(cdt), wkv_ref[...],
                 preferred_element_type=jnp.float32) + bkv_ref[...]
    k = kv[:, :E]
    v = kv[:, E:]

    # additive key-padding mask built in-kernel from the (1, Sk) mask row
    bias = jnp.where(mask_ref[0] == 0.0, NEG_INF, 0.0)          # (1, Sk)

    q16 = (q * scale).astype(cdt)                   # pre-scale q (cheaper than scores)
    k16 = k.astype(cdt)
    v16 = v.astype(cdt)

    heads = []
    for h in range(num_heads):
        lo, hi = h * dh, (h + 1) * dh
        s = jnp.einsum("qd,kd->qk", q16[:, lo:hi], k16[:, lo:hi],
                       preferred_element_type=jnp.float32) + bias
        s = s - jnp.max(s, axis=-1, keepdims=True)
        pexp = jnp.exp(s)
        pexp = pexp * pl.reciprocal(jnp.sum(pexp, axis=-1, keepdims=True),
                                    approx=True)
        heads.append(jnp.dot(pexp.astype(cdt), v16[:, lo:hi],
                             preferred_element_type=jnp.float32))
    ctx = jnp.concatenate(heads, axis=-1)           # (Sq, E)

    out = jnp.dot(ctx.astype(cdt), wo_ref[...],
                  preferred_element_type=jnp.float32) + bo_ref[...]
    out = out + xq                                  # residual

    if has_ln:                                      # post-LN epilogue (f32)
        mu = jnp.mean(out, axis=-1, keepdims=True)
        oc = out - mu
        var = jnp.mean(oc * oc, axis=-1, keepdims=True)
        out = oc * lax.rsqrt(var + eps) * g_ref[...] + beta_ref[...]

    o_ref[0] = out


def mha_block(xq, xkv, mask_k, p, num_heads, ln=None, eps=LN_EPS):
    """out = [LayerNorm](xq + MHA(xq, xkv, xkv, key_padding=(mask_k==0)))."""
    B, Sq, E = xq.shape
    Sk = xkv.shape[1]
    dh = E // num_heads
    scale = 1.0 / math.sqrt(dh)
    mask3 = mask_k.reshape(B, 1, Sk).astype(jnp.float32)

    inputs = [xq, xkv, mask3,
              p["wq"], p["bq"].reshape(1, E),
              p["wkv"], p["bkv"].reshape(1, 2 * E),
              p["wo"], p["bo"].reshape(1, E)]
    in_specs = [
        pl.BlockSpec((1, Sq, E), lambda b: (b, 0, 0)),
        pl.BlockSpec((1, Sk, E), lambda b: (b, 0, 0)),
        pl.BlockSpec((1, 1, Sk), lambda b: (b, 0, 0)),
        pl.BlockSpec((E, E), lambda b: (0, 0)),       # weights: constant index_map
        pl.BlockSpec((1, E), lambda b: (0, 0)),       # -> stay resident across batch
        pl.BlockSpec((E, 2 * E), lambda b: (0, 0)),
        pl.BlockSpec((1, 2 * E), lambda b: (0, 0)),
        pl.BlockSpec((E, E), lambda b: (0, 0)),
        pl.BlockSpec((1, E), lambda b: (0, 0)),
    ]
    has_ln = ln is not None
    if has_ln:
        inputs += [ln[0].reshape(1, E), ln[1].reshape(1, E)]
        in_specs += [pl.BlockSpec((1, E), lambda b: (0, 0)),
                     pl.BlockSpec((1, E), lambda b: (0, 0))]

    return pl.pallas_call(
        functools.partial(_mha_kernel, num_heads=num_heads, scale=scale,
                          has_ln=has_ln, eps=eps),
        out_shape=jax.ShapeDtypeStruct((B, Sq, E), jnp.float32),
        grid=(B,),
        in_specs=in_specs,
        out_specs=pl.BlockSpec((1, Sq, E), lambda b: (b, 0, 0)),
        compiler_params=pltpu.CompilerParams(dimension_semantics=("parallel",)),
    )(*inputs)


# ------------------- fused FFN + residual + LayerNorm -------------------

def _ffn_ln_kernel(x_ref, w1_ref, b1_ref, w2_ref, b2_ref, g_ref, beta_ref,
                   o_ref, *, eps):
    x = x_ref[...]                                  # (tm, D) f32
    cdt = w1_ref.dtype
    h = jnp.dot(x.astype(cdt), w1_ref[...],
                preferred_element_type=jnp.float32) + b1_ref[...]
    h = jnp.maximum(h, 0.0)                         # ReLU; (tm, dff) stays in VMEM
    y = jnp.dot(h.astype(cdt), w2_ref[...],
                preferred_element_type=jnp.float32) + b2_ref[...]
    y = y + x                                       # residual
    mu = jnp.mean(y, axis=-1, keepdims=True)
    yc = y - mu
    var = jnp.mean(yc * yc, axis=-1, keepdims=True)
    o_ref[...] = yc * lax.rsqrt(var + eps) * g_ref[...] + beta_ref[...]


def ffn_block(x, p, eps=LN_EPS):
    """x = LayerNorm(x + lin2(relu(lin1(x)))), fused in one kernel."""
    B, S, D = x.shape
    dff = p["lin1"]["w"].shape[1]
    M = B * S
    x2 = x.reshape(M, D)
    tm = M if M <= 256 else 256
    grid = (pl.cdiv(M, tm),)

    out = pl.pallas_call(
        functools.partial(_ffn_ln_kernel, eps=eps),
        out_shape=jax.ShapeDtypeStruct((M, D), jnp.float32),
        grid=grid,
        in_specs=[
            pl.BlockSpec((tm, D), lambda i: (i, 0)),
            pl.BlockSpec((D, dff), lambda i: (0, 0)),
            pl.BlockSpec((1, dff), lambda i: (0, 0)),
            pl.BlockSpec((dff, D), lambda i: (0, 0)),
            pl.BlockSpec((1, D), lambda i: (0, 0)),
            pl.BlockSpec((1, D), lambda i: (0, 0)),
            pl.BlockSpec((1, D), lambda i: (0, 0)),
        ],
        out_specs=pl.BlockSpec((tm, D), lambda i: (i, 0)),
        compiler_params=pltpu.CompilerParams(dimension_semantics=("parallel",)),
    )(x2, p["lin1"]["w"], p["lin1"]["b"].reshape(1, dff),
      p["lin2"]["w"], p["lin2"]["b"].reshape(1, D),
      p["ln2_g"].reshape(1, D), p["ln2_b"].reshape(1, D))
    return out.reshape(B, S, D)


# ------------------- fused masked attention pool -------------------

def _attn_pool_kernel(x_ref, m_ref, w1_ref, b1_ref, w2_ref, b2_ref, o_ref):
    x = x_ref[0]                                    # (S, D)
    m = m_ref[0]                                    # (S, 1)
    cdt = w1_ref.dtype
    h = jnp.tanh(jnp.dot(x.astype(cdt), w1_ref[...],
                         preferred_element_type=jnp.float32) + b1_ref[...])
    s = jnp.dot(h.astype(cdt), w2_ref[...],
                preferred_element_type=jnp.float32) + b2_ref[...]   # (S, 1)
    s = jnp.where(m == 0.0, NEG_INF, s)
    s = s - jnp.max(s, axis=0, keepdims=True)
    w = jnp.exp(s)
    w = w * pl.reciprocal(jnp.sum(w, axis=0, keepdims=True), approx=True)
    o_ref[0] = jnp.sum(x * w, axis=0, keepdims=True)


def masked_attention_pool(x, mask, p1, p2):
    """Scoring MLP (Linear->Tanh->Linear) + masked softmax + pooled sum."""
    B, S, D = x.shape
    dpool = p1["w"].shape[1]
    out = pl.pallas_call(
        _attn_pool_kernel,
        out_shape=jax.ShapeDtypeStruct((B, 1, D), jnp.float32),
        grid=(B,),
        in_specs=[
            pl.BlockSpec((1, S, D), lambda b: (b, 0, 0)),
            pl.BlockSpec((1, S, 1), lambda b: (b, 0, 0)),
            pl.BlockSpec((D, dpool), lambda b: (0, 0)),
            pl.BlockSpec((1, dpool), lambda b: (0, 0)),
            pl.BlockSpec((dpool, 1), lambda b: (0, 0)),
            pl.BlockSpec((1, 1), lambda b: (0, 0)),
        ],
        out_specs=pl.BlockSpec((1, 1, D), lambda b: (b, 0, 0)),
        compiler_params=pltpu.CompilerParams(dimension_semantics=("parallel",)),
    )(x, mask.reshape(B, S, 1).astype(jnp.float32),
      p1["w"], p1["b"].reshape(1, dpool), p2["w"], p2["b"].reshape(1, 1))
    return out.reshape(B, D)


# ----------------------------- model blocks -----------------------------

def transformer_encoder_layer(x, mask, p, num_heads):
    """nn.TransformerEncoderLayer (batch_first, post-LN, ReLU, eval mode)."""
    x = mha_block(x, x, mask, p["mha"], num_heads, ln=(p["ln1_g"], p["ln1_b"]))
    x = ffn_block(x, p)
    return x


def h1nmr_encoder(x, src_mask, p, num_heads):
    # TODO(synk): H1nmr_embedding not provided; modeled as Linear(F_H -> d_model).
    # The reference builds an expanded (B*H, S, S) attn_mask from the padding
    # mask; it is equivalent to a key-padding mask, so we pass only (B, S).
    out = linear(x, p["embed"])
    for lp in p["layers"]:
        out = transformer_encoder_layer(out, src_mask, lp, num_heads)
    return out


def c13nmr_encoder(x, src_mask, p, num_heads):
    # TODO(synk): C13nmr_embedding not provided; modeled as Linear(1 -> d_model).
    out = linear(x[..., None], p["embed"])
    for lp in p["layers"]:
        out = transformer_encoder_layer(out, src_mask, lp, num_heads)
    return out


def nmr_fusion(h_feat, mask_H, c_feat, mask_C, p, num_heads=8):
    # bi_crossattn_fusion_mode='add', pool_mode='attn_pool',
    # crossmodal_fusion_mode='concat_linear'
    H_aligned = linear(h_feat, p["proj_h"])
    C_aligned = linear(c_feat, p["proj_c"])
    # fused_X = X_aligned + cross_attn(X, Y, Y) -> residual epilogue, no LN
    fused_H = mha_block(H_aligned, C_aligned, mask_C, p["cross_ab"], num_heads)
    fused_C = mha_block(C_aligned, H_aligned, mask_H, p["cross_ba"], num_heads)
    global_H = masked_attention_pool(fused_H, mask_H, p["pool1"], p["pool2"])
    global_C = masked_attention_pool(fused_C, mask_C, p["pool1"], p["pool2"])
    merged = jnp.concatenate([global_H, global_C], axis=-1)
    return linear(merged, p["concat"])


def create_mask(batch_size, max_seq_len, num_peak):
    return (jnp.arange(max_seq_len)[None, :] < num_peak[:, None]).astype(jnp.float32)


def nmr_encoder_forward(params, condition, n_head):
    H1nmr, num_H_peak, C13nmr, num_C_peak = condition
    batch_size, max_seq_len_H, _ = H1nmr.shape
    mask_H = create_mask(batch_size, max_seq_len_H, num_H_peak)
    _, max_seq_len_C = C13nmr.shape
    mask_C = create_mask(batch_size, max_seq_len_C, num_C_peak)
    h_feat = h1nmr_encoder(H1nmr, mask_H, params["h_encoder"], n_head)
    c_feat = c13nmr_encoder(C13nmr, mask_C, params["c_encoder"], n_head)
    return nmr_fusion(h_feat, mask_H, c_feat, mask_C, params["fusion"],
                      num_heads=params["fusion_heads"])


# ----------------------------- parameter init -----------------------------

def init_linear_params(key, din, dout):
    kw, kb = jax.random.split(key)
    w = jax.random.normal(kw, (din, dout), jnp.float32) * 0.05
    b = jax.random.normal(kb, (dout,), jnp.float32) * 0.01
    if din >= 8:   # store MXU operands in bf16; keep tiny-K (embed) weights f32
        w = w.astype(jnp.bfloat16)
    return {"w": w, "b": b}


def init_mha_params(key, E):
    kq, kk, kv, ko = jax.random.split(key, 4)
    q = init_linear_params(kq, E, E)
    k = init_linear_params(kk, E, E)
    v = init_linear_params(kv, E, E)
    o = init_linear_params(ko, E, E)
    return {"wq": q["w"], "bq": q["b"],
            "wkv": jnp.concatenate([k["w"], v["w"]], axis=1),   # fused K|V proj
            "bkv": jnp.concatenate([k["b"], v["b"]]),
            "wo": o["w"], "bo": o["b"]}


def init_encoder_layer(key, d_model, dff):
    k1, k2, k3 = jax.random.split(key, 3)
    return {
        "mha": init_mha_params(k1, d_model),
        "lin1": init_linear_params(k2, d_model, dff),
        "lin2": init_linear_params(k3, dff, d_model),
        "ln1_g": jnp.ones((d_model,), jnp.float32),
        "ln1_b": jnp.zeros((d_model,), jnp.float32),
        "ln2_g": jnp.ones((d_model,), jnp.float32),
        "ln2_b": jnp.zeros((d_model,), jnp.float32),
    }


def init_params(key, *, feat_H, dim_H, dimff_H, dim_C, dimff_C,
                hidden_dim, num_layers, fusion_heads):
    keys = jax.random.split(key, 12)
    h_layers = [init_encoder_layer(k, dim_H, dimff_H)
                for k in jax.random.split(keys[0], num_layers)]
    c_layers = [init_encoder_layer(k, dim_C, dimff_C)
                for k in jax.random.split(keys[1], num_layers)]
    return {
        "h_encoder": {"embed": init_linear_params(keys[2], feat_H, dim_H),
                      "layers": h_layers},
        "c_encoder": {"embed": init_linear_params(keys[3], 1, dim_C),
                      "layers": c_layers},
        "fusion": {
            "proj_h": init_linear_params(keys[4], dim_H, hidden_dim),
            "proj_c": init_linear_params(keys[5], dim_C, hidden_dim),
            "cross_ab": init_mha_params(keys[6], hidden_dim),
            "cross_ba": init_mha_params(keys[7], hidden_dim),
            "pool1": init_linear_params(keys[8], hidden_dim, 128),
            "pool2": init_linear_params(keys[9], 128, 1),
            # PyTorch hard-codes Linear(1024, 512) assuming hidden_dim=512.
            "concat": init_linear_params(keys[10], 2 * hidden_dim, hidden_dim),
        },
        "fusion_heads": fusion_heads,
    }


# ----------------------------- main -----------------------------

if __name__ == "__main__":
    B = 2
    S_H, F_H = 8, 3        # H1nmr: (B, S_H, F_H)
    S_C = 12               # C13nmr: (B, S_C) scalar peaks
    dim_H, dimff_H = 32, 64
    dim_C, dimff_C = 16, 32
    hidden_dim = 64
    n_head = 4
    num_layers = 2
    fusion_heads = 8       # nn.MultiheadAttention default in NMR_fusion

    root = jax.random.PRNGKey(0)
    k_param, k_h, k_c = jax.random.split(root, 3)

    params = init_params(k_param, feat_H=F_H, dim_H=dim_H, dimff_H=dimff_H,
                         dim_C=dim_C, dimff_C=dimff_C, hidden_dim=hidden_dim,
                         num_layers=num_layers, fusion_heads=fusion_heads)

    H1nmr = jax.random.normal(k_h, (B, S_H, F_H), jnp.float32)
    C13nmr = jax.random.normal(k_c, (B, S_C), jnp.float32)
    num_H_peak = jnp.array([5, 8], jnp.int32)
    num_C_peak = jnp.array([7, 12], jnp.int32)

    out = nmr_encoder_forward(params, (H1nmr, num_H_peak, C13nmr, num_C_peak), n_head)
    out = jax.block_until_ready(out)
    assert out.shape == (B, hidden_dim), out.shape
    assert bool(jnp.all(jnp.isfinite(out)))
    print("KERNEL_OK")
</pallas_src>

<mosaic_0001>
module attributes {stable_mosaic.version = 11 : i64} {
  func.func @_linear_kernel(%arg0: i32, %arg1: i32, %arg2: i32, %arg3: memref<16x3xf32, #tpu.memory_space<vmem>>, %arg4: memref<3x32xf32, #tpu.memory_space<vmem>>, %arg5: memref<1x32xf32, #tpu.memory_space<vmem>>, %arg6: memref<16x32xf32, #tpu.memory_space<vmem>>, %arg7: memref<16x32xf32, #tpu.memory_space<vmem>>) attributes {dimension_semantics = [#tpu.dimension_semantics<parallel>, #tpu.dimension_semantics<parallel>, #tpu.dimension_semantics<arbitrary>], iteration_bounds = array<i64: 1, 1, 1>, scalar_prefetch = 0 : i64, scratch_operands = 1 : i64, tpu.core_type = #tpu.core_type<tc>, window_params = [{transform_indices = @transform_0, window_bounds = array<i64: 16, 3>}, {transform_indices = @transform_1, window_bounds = array<i64: 3, 32>}, {transform_indices = @transform_2, window_bounds = array<i64: 1, 32>}, {transform_indices = @transform_3, window_bounds = array<i64: 16, 32>}]} {
    %c0_i32 = arith.constant 0 : i32
    %0 = arith.cmpi eq, %arg2, %c0_i32 : i32
    %1 = arith.extui %0 : i1 to i32
    %c0_i32_0 = arith.constant 0 : i32
    %2 = arith.cmpi ne, %1, %c0_i32_0 : i32
    scf.if %2 {
      %cst_10 = arith.constant 0.000000e+00 : f32
      %12 = vector.broadcast %cst_10 : f32 to vector<16x32xf32>
      %c0_11 = arith.constant 0 : index
      %c0_12 = arith.constant 0 : index
      %13 = vector.load %arg7[%c0_11, %c0_12] : memref<16x32xf32, #tpu.memory_space<vmem>>, vector<16x32xf32>
      tpu.vector_store %arg7[%c0_11, %c0_12], %12 {strides = array<i32>} : memref<16x32xf32, #tpu.memory_space<vmem>>, vector<16x32xf32>,
    } else {
    }
    %c0 = arith.constant 0 : index
    %c0_1 = arith.constant 0 : index
    %3 = vector.load %arg7[%c0, %c0_1] : memref<16x32xf32, #tpu.memory_space<vmem>>, vector<16x32xf32>
    %c0_2 = arith.constant 0 : index
    %c0_3 = arith.constant 0 : index
    %4 = vector.load %arg3[%c0_2, %c0_3] : memref<16x3xf32, #tpu.memory_space<vmem>>, vector<16x3xf32>
    %c0_4 = arith.constant 0 : index
    %c0_5 = arith.constant 0 : index
    %5 = vector.load %arg4[%c0_4, %c0_5] : memref<3x32xf32, #tpu.memory_space<vmem>>, vector<3x32xf32>
    %cst = arith.constant dense<0.000000e+00> : vector<16x32xf32>
    %6 = tpu.matmul %4, %5, %cst {dimension_numbers = #tpu.dot_dimension_numbers<[1], [0], [0], [1], [0, 0, 1, 1], [], []>} : vector<16x3xf32>, vector<3x32xf32>, vector<16x32xf32> -> vector<16x32xf32>
    %7 = arith.addf %3, %6 : vector<16x32xf32>
    %c0_6 = arith.constant 0 : index
    %c0_7 = arith.constant 0 : index
    %8 = vector.load %arg7[%c0_6, %c0_7] : memref<16x32xf32, #tpu.memory_space<vmem>>, vector<16x32xf32>
    tpu.vector_store %arg7[%c0_6, %c0_7], %7 {strides = array<i32>} : memref<16x32xf32, #tpu.memory_space<vmem>>, vector<16x32xf32>,
    %c0_i32_8 = arith.constant 0 : i32
    %9 = arith.cmpi eq, %arg2, %c0_i32_8 : i32
    %10 = arith.extui %9 : i1 to i32
    %c0_i32_9 = arith.constant 0 : i32
    %11 = arith.cmpi ne, %10, %c0_i32_9 : i32
    scf.if %11 {
      %c0_10 = arith.constant 0 : index
      %c0_11 = arith.constant 0 : index
      %12 = vector.load %arg7[%c0_10, %c0_11] : memref<16x32xf32, #tpu.memory_space<vmem>>, vector<16x32xf32>
      %c0_12 = arith.constant 0 : index
      %c0_13 = arith.constant 0 : index
      %13 = vector.load %arg5[%c0_12, %c0_13] : memref<1x32xf32, #tpu.memory_space<vmem>>, vector<1x32xf32>
      %14 = vector.broadcast %13 : vector<1x32xf32> to vector<16x32xf32>
      %15 = arith.addf %12, %14 : vector<16x32xf32>
      %c0_14 = arith.constant 0 : index
      %c0_15 = arith.constant 0 : index
      %16 = vector.load %arg6[%c0_14, %c0_15] : memref<16x32xf32, #tpu.memory_space<vmem>>, vector<16x32xf32>
      tpu.vector_store %arg6[%c0_14, %c0_15], %15 {strides = array<i32>} : memref<16x32xf32, #tpu.memory_space<vmem>>, vector<16x32xf32>,
    } else {
    }
    return
  }
  func.func @transform_0(%arg0: i32, %arg1: i32, %arg2: i32) -> (i32, i32) {
    %c0_i32 = arith.constant 0 : i32
    return %arg0, %arg2 : i32, i32
  }
  func.func @transform_1(%arg0: i32, %arg1: i32, %arg2: i32) -> (i32, i32) {
    %c0_i32 = arith.constant 0 : i32
    return %arg2, %arg1 : i32, i32
  }
  func.func @transform_2(%arg0: i32, %arg1: i32, %arg2: i32) -> (i32, i32) {
    %c0_i32 = arith.constant 0 : i32
    %c0_i32_0 = arith.constant 0 : i32
    return %c0_i32, %arg1 : i32, i32
  }
  func.func @transform_3(%arg0: i32, %arg1: i32, %arg2: i32) -> (i32, i32) {
    %c0_i32 = arith.constant 0 : i32
    return %arg0, %arg1 : i32, i32
  }
}

</mosaic_0001>

<bundles_post_ra>
// kernel: tpu_custom_call.1
= control target key start
LH: loop header
LB: loop body
LE: loop exit
PB: predicated region body
PF: predicated region fallthrough
CT: control target
= control target key end

     0   :  { %vm34_vm0 = vcmask 1042432   ;;  %vm27_vm1 = vcmask 23552   ;;  %vm19_vm2 = vcmask 261120   ;;  %s177_s0 = inlined_call_operand.vmem [shape: f32[16,3], index: 0, kind: input, shape index: {}]   ;;  %s178_s1 = inlined_call_operand.vmem [shape: f32[3,32], index: 1, kind: input, shape index: {}]   ;;  %s179_s2 = inlined_call_operand.vmem [shape: f32[1,32], index: 2, kind: input, shape index: {}]   ;;  %s180_s3 = inlined_call_operand.hbm [shape: f32[16,32], index: 3, kind: output, shape index: {}]  }
   0x1   :  { %v26_v0 = vld [vmem:[%s178_s1] sm:$0x7]  ;;  %v25_v2 = vld [vmem:[%s177_s0 + $0x8] sm:$0xff] }
   0x2   :  { %v24_v1 = vld [vmem:[%s177_s0] sm:$0xff]  ;;  %97 = vmatpush.msk.msra.mxu0 %vm34_vm0, %v26_v0  ;;  %100 = vmatpush.msk.msra.mxu1 %vm34_vm0, %v26_v0 }
   0x3   :  { %8 = vsyncpa [#allocation4], 0  ;;  %98 = vmatmul.msk.f32.vlgmr.msra.gmra.mxu0 %vm27_vm1, %v24_v1  ;;  %99 = vmatmul.msk.f32.vlgmr.msra.gmra.mxu1 %vm27_vm1, %v25_v2  ;;  %v132_v3 = vmov 0.0   ;;  %v105_v10 = vld [vmem:[%s179_s2] ss:$0 sm:$0xff]  ;;  %s133_s18 = smov [#allocation3]  }
   0x4   :  { %20 = vst.msk [vmem:[#allocation2] sm:$0xff] %vm19_vm2, %v132_v3  ;;  %s83_s19 = sshll.u32 %s133_s18, 4  ;;  %s85_s22 = sshll.u32 %s180_s3, 4  ;;  %s84_s19 = int_to_ptr.vmem [resolvable:$true] %s83_s19  ;;  %s86_s22 = int_to_ptr.hbm [resolvable:$true] %s85_s22 }
   0x5   :  { %21 = vst.msk [vmem:[#allocation2 + $0x8] sm:$0xff] %vm19_vm2, %v132_v3  ;;  %s134_s23 = smov 128   ;;  %s135_s24 = smov 8  }
   0xb   :  { %v22_v4 = vld [vmem:[#allocation2] sm:$0xff] }
   0xc   :  { %v23_v5 = vld [vmem:[#allocation2 + $0x8] sm:$0xff] }
  0x80   :  { %v55_v6 = vpop.f32.mrf.mxu0  ;;  %v58_v7 = vpop.f32.mrf.mxu1 }
  0x81   :  { %v61_v8 = vadd.f32 %v55_v6, %v22_v4  ;;  %v62_v9 = vadd.f32 %v58_v7, %v23_v5 }
  0x83   :  { %64 = vst.msk [vmem:[#allocation2] sm:$0xff] %vm19_vm2, %v61_v8 }
  0x84   :  { %65 = vst.msk [vmem:[#allocation2 + $0x8] sm:$0xff] %vm19_vm2, %v62_v9 }
  0x8a   :  { %v69_v11 = vld [vmem:[#allocation2] sm:$0xff] }
  0x8b   :  { %v70_v12 = vld [vmem:[#allocation2 + $0x8] sm:$0xff]  ;;  %v75_v13 = vadd.f32 %v105_v10, %v69_v11 }
  0x8c   :  { %v76_v14 = vadd.f32 %v105_v10, %v70_v12 }
  0x8d   :  { %77 = vst.msk [vmem:[#allocation3] sm:$0xff] %vm19_vm2, %v75_v13 }
  0x8e   :  { %78 = vst.msk [vmem:[#allocation3 + $0x8] sm:$0xff] %vm19_vm2, %v76_v14 }
  0x8f   :  { %91 = dma.vmem_to_hbm [thread:$0]  %s84_s19, 256, %s86_s22, [#allocation4], %s134_s23, %s134_s23, %s135_s24  }
  0x90   :  { %130 = dma.done.wait [#allocation4], 256  }
  0x91   :  { %131 = vsyncadd [#allocation4], 4294967040 }
  0x92   :  { %96 = vsyncpa [#allocation4], 1 }

</bundles_post_ra>
